<compile_context>
chip_gen: v5e
topology: v5e:2x2
jax: 0.10.0
libtpu: 0.0.40
codegen_flags: <defaults>
</compile_context>

<pallas_src>
import functools

import jax
import jax.numpy as jnp
from jax import lax
from jax.experimental import pallas as pl
from jax.experimental.pallas import tpu as pltpu


def _pick_tile(total, max_tile, mult=8):
    """Largest multiple-of-`mult` divisor of `total` that is <= max_tile."""
    t = min(total, max_tile)
    t -= t % mult
    while t >= mult:
        if total % t == 0:
            return t
        t -= mult
    return total


# ---------------------------------------------------------------------------
# Row-tiled matmul + bias (+ReLU) — feature extractor ("conv as matmul").
# ---------------------------------------------------------------------------
def _mm_bias_kernel(x_ref, w_ref, b_ref, o_ref, *, relu):
    acc = jnp.dot(x_ref[...], w_ref[...], preferred_element_type=jnp.float32)
    acc = acc + b_ref[...]
    if relu:
        acc = jnp.maximum(acc, 0.0)
    o_ref[...] = acc.astype(o_ref.dtype)


def mm_bias(x, w, b, relu=False, out_dtype=jnp.float32, tile_n=2048):
    N, K = x.shape
    M = w.shape[1]
    tn = min(N, tile_n)
    grid = (pl.cdiv(N, tn),)
    return pl.pallas_call(
        functools.partial(_mm_bias_kernel, relu=relu),
        out_shape=jax.ShapeDtypeStruct((N, M), out_dtype),
        grid=grid,
        in_specs=[pl.BlockSpec((tn, K), lambda i: (i, 0)),
                  pl.BlockSpec((K, M), lambda i: (0, 0)),
                  pl.BlockSpec((1, M), lambda i: (0, 0))],
        out_specs=pl.BlockSpec((tn, M), lambda i: (i, 0)),
        compiler_params=pltpu.CompilerParams(dimension_semantics=("parallel",)),
    )(x, w, b.reshape(1, M))


def _patchify(img):
    B, C, H, W = img.shape
    H4, W4 = H // 4, W // 4          # TODO(synk): truncates if H/W not multiple of 4
    p = img.reshape(B, C, H4, 4, W4, 4)
    p = p.transpose(0, 2, 4, 1, 3, 5).reshape(B * H4 * W4, C * 16)
    return p, (B, H4, W4)


def extract_features_pair(img_l, img_r, w, b):
    patches_l, (B, H4, W4) = _patchify(img_l)
    patches_r, _ = _patchify(img_r)
    # One matmul covering both images (halves fixed overhead, shared weight load).
    feats = mm_bias(jnp.concatenate([patches_l, patches_r], axis=0),
                    w, b, relu=True, out_dtype=jnp.bfloat16)
    n = B * H4 * W4
    C = w.shape[1]
    feat_l = feats[:n].reshape(B, H4, W4, C)
    feat_r = feats[n:].reshape(B, H4, W4, C)
    return feat_l, feat_r


# ---------------------------------------------------------------------------
# Fused group-wise correlation + pointwise aggregation MLP.
#   Per row-tile (grid), inner pl.loop over disparities:
#     - double-buffered DMA of the d-shifted right-feature window from HBM
#     - prod = fl * fr (bf16)
#     - cost = relu(prod @ (gmat @ w_agg1) + b_agg1) @ w_agg2 + b_agg2
#   written as a lane-dense [TR, W4] slab per disparity.
# ---------------------------------------------------------------------------
def _gwc_agg_kernel(fl_ref, frp_ref, w1_ref, b1_ref, w2_ref, b2_ref, o_ref,
                    fr_buf, sem, *, d0, pad_left, n_disp):
    TR, W4, C = fl_ref.shape
    r0 = pl.program_id(0) * TR

    def start_fetch(di, slot):
        start = pad_left - (d0 + di)          # >= 0 by padding construction
        pltpu.make_async_copy(
            frp_ref.at[pl.ds(r0, TR), pl.ds(start, W4), :],
            fr_buf.at[slot],
            sem.at[slot],
        ).start()

    start_fetch(0, 0)                          # prime slot 0

    @pl.loop(0, n_disp)
    def _(di):
        slot = di & 1
        pltpu.make_async_copy(
            frp_ref.at[pl.ds(0, TR), pl.ds(0, W4), :],
            fr_buf.at[slot],
            sem.at[slot],
        ).wait()

        @pl.when(di + 1 < n_disp)
        def _():
            start_fetch(di + 1, 1 - slot)      # prefetch next disparity

        prod = (fl_ref[...] * fr_buf[slot]).reshape(TR * W4, C)   # bf16
        h = jnp.dot(prod, w1_ref[...], preferred_element_type=jnp.float32)
        h = jnp.maximum(h + b1_ref[...], 0.0)
        cost = jnp.dot(h, w2_ref[...], preferred_element_type=jnp.float32)
        cost = cost + b2_ref[...]
        o_ref[di] = cost.reshape(TR, W4)


def gwc_agg_volume(feat_l, feat_r, min_disp4, max_disp4, groups,
                   w_agg1, b_agg1, w_agg2, b_agg2):
    B, H4, W4, C = feat_l.shape
    D4 = max_disp4 - min_disp4
    hidden = w_agg1.shape[1]
    cpg = C // groups

    # gmat: channel -> group mean.  ReLU sits after agg1, so gmat @ w_agg1 is a
    # legal pre-composition (pure linear algebra before the nonlinearity).
    gmat = (jnp.arange(C)[:, None] // cpg == jnp.arange(groups)[None, :])
    gmat = gmat.astype(jnp.float32) / float(cpg)
    w1p = (gmat @ w_agg1).astype(jnp.bfloat16)                    # [C, hidden]

    pad_left = max(max_disp4 - 1, 0)
    pad_right = max(-min_disp4, 0)
    fr_pad = jnp.pad(feat_r, ((0, 0), (0, 0), (pad_left, pad_right), (0, 0)))
    Wp = W4 + pad_left + pad_right

    rows = B * H4
    fl2 = feat_l.reshape(rows, W4, C)
    fr2 = fr_pad.reshape(rows, Wp, C)
    TR = _pick_tile(rows, 128)
    grid = (rows // TR,)

    out = pl.pallas_call(
        functools.partial(_gwc_agg_kernel, d0=min_disp4, pad_left=pad_left,
                          n_disp=D4),
        out_shape=jax.ShapeDtypeStruct((D4, rows, W4), jnp.float32),
        grid=grid,
        in_specs=[
            pl.BlockSpec((TR, W4, C), lambda r: (r, 0, 0)),       # left features
            pl.BlockSpec(memory_space=pl.ANY),                    # right (HBM, DMA'd)
            pl.BlockSpec((C, hidden), lambda r: (0, 0)),
            pl.BlockSpec((1, hidden), lambda r: (0, 0)),
            pl.BlockSpec((hidden, 1), lambda r: (0, 0)),
            pl.BlockSpec((1, 1), lambda r: (0, 0)),
        ],
        out_specs=pl.BlockSpec((D4, TR, W4), lambda r: (0, r, 0)),
        scratch_shapes=[
            pltpu.VMEM((2, TR, W4, C), jnp.bfloat16),             # fr double buffer
            pltpu.SemaphoreType.DMA((2,)),
        ],
        compiler_params=pltpu.CompilerParams(
            dimension_semantics=("parallel",),
            vmem_limit_bytes=48 * 1024 * 1024,
        ),
    )(fl2, fr2, w1p,
      b_agg1.reshape(1, hidden).astype(jnp.float32),
      w_agg2.astype(jnp.float32),
      b_agg2.reshape(1, 1).astype(jnp.float32))
    return out                                                    # [D4, B*H4, W4]


# ---------------------------------------------------------------------------
# Fused trilinear upsample (align_corners=False) + SoftArgMax.
# Per (batch, H-tile): quarter-res cost slab -> H/W/D interpolation as 2-D MXU
# matmuls in VMEM -> softmax + expectation over D -> [TH, W] disparity tile.
# ---------------------------------------------------------------------------
def _interp_matrix(in_size, out_size):
    scale = in_size / out_size
    out_idx = jnp.arange(out_size, dtype=jnp.float32)
    src = jnp.maximum((out_idx + 0.5) * scale - 0.5, 0.0)
    lo = jnp.minimum(jnp.floor(src).astype(jnp.int32), in_size - 1)
    hi = jnp.minimum(lo + 1, in_size - 1)
    frac = src - lo.astype(jnp.float32)
    rows = jnp.arange(out_size)
    M = jnp.zeros((out_size, in_size), jnp.float32)
    M = M.at[rows, lo].add(1.0 - frac)
    M = M.at[rows, hi].add(frac)
    return M


def _up_softargmax_kernel(c4_ref, md_ref, mh_ref, mwT_ref, o_ref,
                          *, d4, w4, min_disp):
    x = c4_ref[0]                                                  # [H4, D4*W4]
    ch = jnp.dot(mh_ref[...], x, preferred_element_type=jnp.float32)  # [TH, D4*W4]
    th = ch.shape[0]
    chw = jnp.dot(ch.reshape(th * d4, w4), mwT_ref[...],
                  preferred_element_type=jnp.float32)              # [TH*D4, W]
    w_full = chw.shape[1]
    chw = chw.reshape(th, d4, w_full).transpose(1, 0, 2).reshape(d4, th * w_full)
    cd = jnp.dot(md_ref[...], chw, preferred_element_type=jnp.float32)  # [D, TH*W]

    m = jnp.max(cd, axis=0, keepdims=True)
    e = jnp.exp(cd - m)
    s = jnp.sum(e, axis=0, keepdims=True)                          # [1, TH*W]
    d_full = md_ref.shape[0]
    dvals = (lax.broadcasted_iota(jnp.int32, (1, d_full), 1).astype(jnp.float32)
             + float(min_disp))
    num = jnp.dot(dvals, e, preferred_element_type=jnp.float32)    # [1, TH*W]
    disp = num * pl.reciprocal(s, approx=True)
    o_ref[...] = disp.reshape(1, th, w_full)


def upsample_softargmax(cost4, B, H, W, min_disp, max_disp):
    D4, rows, W4 = cost4.shape
    H4 = rows // B
    D = max_disp - min_disp

    # Quarter-res relayout only (cheap); the full-res volume never hits HBM.
    c4h = (cost4.reshape(D4, B, H4, W4)
                .transpose(1, 2, 0, 3)
                .reshape(B, H4, D4 * W4))
    md = _interp_matrix(D4, D)                                     # [D, D4]
    mh = _interp_matrix(H4, H)                                     # [H, H4]
    mwT = _interp_matrix(W4, W).T                                  # [W4, W]

    TH = _pick_tile(H, 16)
    grid = (B, H // TH)
    return pl.pallas_call(
        functools.partial(_up_softargmax_kernel, d4=D4, w4=W4, min_disp=min_disp),
        out_shape=jax.ShapeDtypeStruct((B, H, W), jnp.float32),
        grid=grid,
        in_specs=[
            pl.BlockSpec((1, H4, D4 * W4), lambda b, t: (b, 0, 0)),
            pl.BlockSpec((D, D4), lambda b, t: (0, 0)),
            pl.BlockSpec((TH, H4), lambda b, t: (t, 0)),
            pl.BlockSpec((W4, W), lambda b, t: (0, 0)),
        ],
        out_specs=pl.BlockSpec((1, TH, W), lambda b, t: (b, t, 0)),
        compiler_params=pltpu.CompilerParams(
            dimension_semantics=("parallel", "parallel"),
            vmem_limit_bytes=48 * 1024 * 1024,
        ),
    )(c4h, md, mh, mwT)


# ---------------------------------------------------------------------------
# Parameters and forward pass.
# ---------------------------------------------------------------------------
def init_params(key, image_channel=3, groups=8, feat_channels=128, agg_hidden=16):
    k1, k2, k3 = jax.random.split(key, 3)
    kin = image_channel * 4 * 4
    w_feat = (jax.random.normal(k1, (kin, feat_channels), jnp.float32)
              * jnp.sqrt(2.0 / (4 * 4 * feat_channels)))
    b_feat = jnp.zeros((feat_channels,), jnp.float32)
    w_agg1 = jax.random.normal(k2, (groups, agg_hidden), jnp.float32) * jnp.sqrt(2.0 / agg_hidden)
    b_agg1 = jnp.zeros((agg_hidden,), jnp.float32)
    w_agg2 = jax.random.normal(k3, (agg_hidden, 1), jnp.float32) * jnp.sqrt(2.0)
    b_agg2 = jnp.zeros((1,), jnp.float32)
    return dict(w_feat=w_feat, b_feat=b_feat, w_agg1=w_agg1, b_agg1=b_agg1,
                w_agg2=w_agg2, b_agg2=b_agg2)


def gwcnet_forward(params, img_l, img_r, min_disp, max_disp, groups=8):
    B, _, H, W = img_l.shape
    # Shared feature extractor (fea1 + spp, simplified), bf16 1/4-res features.
    feat_l, feat_r = extract_features_pair(img_l, img_r,
                                           params['w_feat'], params['b_feat'])

    d_min4, d_max4 = min_disp // 4, max_disp // 4
    cost4 = gwc_agg_volume(feat_l, feat_r, d_min4, d_max4, groups,
                           params['w_agg1'], params['b_agg1'],
                           params['w_agg2'], params['b_agg2'])     # [D4, B*H4, W4]

    disp3 = upsample_softargmax(cost4, B, H, W, min_disp, max_disp)  # [B, H, W]
    return {'final_disp': disp3}


if __name__ == "__main__":
    key = jax.random.PRNGKey(0)
    pkey, ikey = jax.random.split(key)
    params = init_params(pkey, image_channel=3, groups=8)
    kl, kr = jax.random.split(ikey)
    img_l = jax.random.normal(kl, (2, 3, 32, 32), jnp.float32)
    img_r = jax.random.normal(kr, (2, 3, 32, 32), jnp.float32)

    out = gwcnet_forward(params, img_l, img_r, min_disp=0, max_disp=16, groups=8)
    disp = jax.block_until_ready(out['final_disp'])
    assert disp.shape == (2, 32, 32)
    assert bool(jnp.all(jnp.isfinite(disp)))
    print("KERNEL_OK")
</pallas_src>

<mosaic_0001>
module attributes {stable_mosaic.version = 11 : i64} {
  func.func @_mm_bias_kernel(%arg0: i32, %arg1: memref<256x48xf32, #tpu.memory_space<vmem>>, %arg2: memref<48x128xf32, #tpu.memory_space<vmem>>, %arg3: memref<1x128xf32, #tpu.memory_space<vmem>>, %arg4: memref<256x128xbf16, #tpu.memory_space<vmem>>) attributes {dimension_semantics = [#tpu.dimension_semantics<parallel>], iteration_bounds = array<i64: 1>, scalar_prefetch = 0 : i64, scratch_operands = 0 : i64, tpu.core_type = #tpu.core_type<tc>, window_params = [{transform_indices = @transform_0, window_bounds = array<i64: 256, 48>}, {pipeline_mode = #tpu.pipeline_mode<synchronous>, transform_indices = @transform_1, window_bounds = array<i64: 48, 128>}, {pipeline_mode = #tpu.pipeline_mode<synchronous>, transform_indices = @transform_2, window_bounds = array<i64: 1, 128>}, {transform_indices = @transform_3, window_bounds = array<i64: 256, 128>}]} {
    %c0 = arith.constant 0 : index
    %c0_0 = arith.constant 0 : index
    %0 = vector.load %arg1[%c0, %c0_0] : memref<256x48xf32, #tpu.memory_space<vmem>>, vector<256x48xf32>
    %c0_1 = arith.constant 0 : index
    %c0_2 = arith.constant 0 : index
    %1 = vector.load %arg2[%c0_1, %c0_2] : memref<48x128xf32, #tpu.memory_space<vmem>>, vector<48x128xf32>
    %cst = arith.constant dense<0.000000e+00> : vector<256x128xf32>
    %2 = tpu.matmul %0, %1, %cst {dimension_numbers = #tpu.dot_dimension_numbers<[1], [0], [0], [1], [0, 0, 1, 1], [], []>} : vector<256x48xf32>, vector<48x128xf32>, vector<256x128xf32> -> vector<256x128xf32>
    %c0_3 = arith.constant 0 : index
    %c0_4 = arith.constant 0 : index
    %3 = vector.load %arg3[%c0_3, %c0_4] : memref<1x128xf32, #tpu.memory_space<vmem>>, vector<1x128xf32>
    %4 = vector.broadcast %3 : vector<1x128xf32> to vector<256x128xf32>
    %5 = arith.addf %2, %4 : vector<256x128xf32>
    %cst_5 = arith.constant 0.000000e+00 : f32
    %6 = vector.broadcast %cst_5 : f32 to vector<256x128xf32>
    %7 = arith.maximumf %5, %6 : vector<256x128xf32>
    %8 = arith.truncf %7 : vector<256x128xf32> to vector<256x128xbf16>
    %c0_6 = arith.constant 0 : index
    %c0_7 = arith.constant 0 : index
    %9 = vector.load %arg4[%c0_6, %c0_7] : memref<256x128xbf16, #tpu.memory_space<vmem>>, vector<256x128xbf16>
    tpu.vector_store %arg4[%c0_6, %c0_7], %8 {strides = array<i32>} : memref<256x128xbf16, #tpu.memory_space<vmem>>, vector<256x128xbf16>,
    return
  }
  func.func @transform_0(%arg0: i32) -> (i32, i32) {
    %c0_i32 = arith.constant 0 : i32
    %c0_i32_0 = arith.constant 0 : i32
    return %arg0, %c0_i32 : i32, i32
  }
  func.func @transform_1(%arg0: i32) -> (i32, i32) {
    %c0_i32 = arith.constant 0 : i32
    %c0_i32_0 = arith.constant 0 : i32
    %c0_i32_1 = arith.constant 0 : i32
    return %c0_i32, %c0_i32_0 : i32, i32
  }
  func.func @transform_2(%arg0: i32) -> (i32, i32) {
    %c0_i32 = arith.constant 0 : i32
    %c0_i32_0 = arith.constant 0 : i32
    %c0_i32_1 = arith.constant 0 : i32
    return %c0_i32, %c0_i32_0 : i32, i32
  }
  func.func @transform_3(%arg0: i32) -> (i32, i32) {
    %c0_i32 = arith.constant 0 : i32
    %c0_i32_0 = arith.constant 0 : i32
    return %arg0, %c0_i32 : i32, i32
  }
}

</mosaic_0001>

<bundles_post_ra>
// kernel: tpu_custom_call.1
= control target key start
LH: loop header
LB: loop body
LE: loop exit
PB: predicated region body
PF: predicated region fallthrough
CT: control target
= control target key end

     0   :  { %s765_s0 = inlined_call_operand.vmem [shape: f32[256,48], index: 0, kind: input, shape index: {}]   ;;  %s766_s1 = inlined_call_operand.vmem [shape: f32[48,128], index: 1, kind: input, shape index: {}]   ;;  %s767_s2 = inlined_call_operand.vmem [shape: f32[1,128], index: 2, kind: input, shape index: {}]   ;;  %s768_s3 = inlined_call_operand.hbm [shape: bf16[256,128], index: 3, kind: output, shape index: {}]  }
   0x1   :  { %v52_v0 = vld [vmem:[%s766_s1 + $0x28] sm:$0xff]  ;;  %v51_v1 = vld [vmem:[%s766_s1 + $0x20] sm:$0xff]  ;;  %v50_v2 = vld [vmem:[%s766_s1 + $0x18] sm:$0xff] }
   0x2   :  { %164 = vmatpush.msra.mxu0 %v52_v0  ;;  %508 = vmatpush.msra.mxu1 %v52_v0  ;;  %v49_v3 = vld [vmem:[%s766_s1 + $0x10] sm:$0xff]  ;;  %v48_v4 = vld [vmem:[%s766_s1 + $0x8] sm:$0xff]  ;;  %v47_v5 = vld [vmem:[%s766_s1] sm:$0xff] }
   0x3   :  { %509 = vmatpush.msra.mxu2 %v52_v0  ;;  %510 = vmatpush.msra.mxu3 %v52_v0 }
   0x4   :  { %165 = vmatpush.msra.mxu0 %v51_v1  ;;  %511 = vmatpush.msra.mxu1 %v51_v1 }
   0x5   :  { %512 = vmatpush.msra.mxu2 %v51_v1  ;;  %513 = vmatpush.msra.mxu3 %v51_v1 }
   0x6   :  { %166 = vmatpush.msra.mxu0 %v50_v2  ;;  %514 = vmatpush.msra.mxu1 %v50_v2 }
   0x7   :  { %515 = vmatpush.msra.mxu2 %v50_v2  ;;  %516 = vmatpush.msra.mxu3 %v50_v2 }
   0x8   :  { %167 = vmatpush.msra.mxu0 %v49_v3  ;;  %517 = vmatpush.msra.mxu1 %v49_v3 }
   0x9   :  { %518 = vmatpush.msra.mxu2 %v49_v3  ;;  %519 = vmatpush.msra.mxu3 %v49_v3 }
   0xa   :  { %8 = vsyncpa [#allocation3], 0  ;;  %168 = vmatpush.msra.mxu0 %v48_v4  ;;  %520 = vmatpush.msra.mxu1 %v48_v4  ;;  %v15_v6 = vld [vmem:[%s765_s0] sm:$0xff]  ;;  %vm57_vm0 = vcmask 392192   ;;  %v16_v10 = vld [vmem:[%s765_s0 + $0x8] sm:$0xff]  ;;  %s369_s8 = sshll.u32 %s768_s3, 4  ;;  %s370_s8 = int_to_ptr.hbm [resolvable:$true] %s369_s8 }
   0xb   :  { %521 = vmatpush.msra.mxu2 %v48_v4  ;;  %522 = vmatpush.msra.mxu3 %v48_v4  ;;  %v23_v7 = vld [vmem:[%s765_s0 + $0x40] sm:$0xff]  ;;  %v24_v11 = vld [vmem:[%s765_s0 + $0x48] sm:$0xff]  ;;  %v17_v14 = vld [vmem:[%s765_s0 + $0x10] sm:$0xff]  ;;  %s557_s9 = smov 64   ;;  %s558_s10 = smov 4  }
   0xc   :  { %169 = vmatpush.msra.mxu0 %v47_v5  ;;  %523 = vmatpush.msra.mxu1 %v47_v5  ;;  %v31_v8 = vld [vmem:[%s765_s0 + $0x80] sm:$0xff]  ;;  %v32_v12 = vld [vmem:[%s765_s0 + $0x88] sm:$0xff]  ;;  %v25_v15 = vld [vmem:[%s765_s0 + $0x50] sm:$0xff] }
   0xd   :  { %v39_v9 = vld [vmem:[%s765_s0 + $0xc0] sm:$0xff]  ;;  %524 = vmatpush.msra.mxu2 %v47_v5  ;;  %525 = vmatpush.msra.mxu3 %v47_v5  ;;  %v40_v13 = vld [vmem:[%s765_s0 + $0xc8] sm:$0xff]  ;;  %v33_v16 = vld [vmem:[%s765_s0 + $0x90] sm:$0xff] }
   0xe   :  { %381 = vmatmul.msk.f32.vlgmr.msra.gmra.mxu0 %vm57_vm0, %v15_v6  ;;  %389 = vmatmul.msk.f32.vlgmr.msra.gmra.mxu1 %vm57_vm0, %v23_v7  ;;  %v41_v17 = vld [vmem:[%s765_s0 + $0xd0] sm:$0xff]  ;;  %v18_v18 = vld [vmem:[%s765_s0 + $0x18] sm:$0xff]  ;;  %v19_v22 = vld [vmem:[%s765_s0 + $0x20] sm:$0xff] }
   0xf   :  { %397 = vmatmul.msk.f32.vlgmr.msra.gmra.mxu2 %vm57_vm0, %v31_v8  ;;  %405 = vmatmul.msk.f32.vlgmr.msra.gmra.mxu3 %vm57_vm0, %v39_v9  ;;  %v26_v19 = vld [vmem:[%s765_s0 + $0x58] sm:$0xff]  ;;  %v27_v23 = vld [vmem:[%s765_s0 + $0x60] sm:$0xff]  ;;  %v20_v26 = vld [vmem:[%s765_s0 + $0x28] sm:$0xff] }
  0x10   :  { %v34_v20 = vld [vmem:[%s765_s0 + $0x98] sm:$0xff]  ;;  %v35_v24 = vld [vmem:[%s765_s0 + $0xa0] sm:$0xff]  ;;  %v28_v27 = vld [vmem:[%s765_s0 + $0x68] sm:$0xff] }
  0x11   :  { %v42_v21 = vld [vmem:[%s765_s0 + $0xd8] sm:$0xff]  ;;  %v43_v25 = vld [vmem:[%s765_s0 + $0xe0] sm:$0xff]  ;;  %v36_v28 = vld [vmem:[%s765_s0 + $0xa8] sm:$0xff] }
  0x12   :  { %v44_v29 = vld [vmem:[%s765_s0 + $0xe8] sm:$0xff]  ;;  %v21_v30 = vld [vmem:[%s765_s0 + $0x30] sm:$0xff]  ;;  %v22_v34 = vld [vmem:[%s765_s0 + $0x38] sm:$0xff] }
  0x13   :  { %v29_v31 = vld [vmem:[%s765_s0 + $0x70] sm:$0xff]  ;;  %v30_v35 = vld [vmem:[%s765_s0 + $0x78] sm:$0xff]  ;;  %v728_v40 = vld [vmem:[%s767_s2] ss:$0 sm:$0xff] }
  0x14   :  { %v37_v32 = vld [vmem:[%s765_s0 + $0xb0] sm:$0xff]  ;;  %v38_v36 = vld [vmem:[%s765_s0 + $0xb8] sm:$0xff] }
  0x15   :  { %v45_v33 = vld [vmem:[%s765_s0 + $0xf0] sm:$0xff]  ;;  %v46_v37 = vld [vmem:[%s765_s0 + $0xf8] sm:$0xff]  ;;  %s556_s0 = smov [#allocation2]  }
  0x16   :  { %382 = vmatmul.msk.f32.gmra.mxu0 %vm57_vm0, %v16_v10  ;;  %390 = vmatmul.msk.f32.gmra.mxu1 %vm57_vm0, %v24_v11  ;;  %s367_s2 = sshll.u32 %s556_s0, 4  ;;  %s368_s2 = int_to_ptr.vmem [resolvable:$true] %s367_s2 }
  0x17   :  { %398 = vmatmul.msk.f32.gmra.mxu2 %vm57_vm0, %v32_v12  ;;  %406 = vmatmul.msk.f32.gmra.mxu3 %vm57_vm0, %v40_v13 }
  0x1e   :  { %383 = vmatmul.msk.f32.gmra.mxu0 %vm57_vm0, %v17_v14  ;;  %391 = vmatmul.msk.f32.gmra.mxu1 %vm57_vm0, %v25_v15 }
  0x1f   :  { %399 = vmatmul.msk.f32.gmra.mxu2 %vm57_vm0, %v33_v16  ;;  %407 = vmatmul.msk.f32.gmra.mxu3 %vm57_vm0, %v41_v17 }
  0x26   :  { %384 = vmatmul.msk.f32.gmra.mxu0 %vm57_vm0, %v18_v18  ;;  %392 = vmatmul.msk.f32.gmra.mxu1 %vm57_vm0, %v26_v19 }
  0x27   :  { %400 = vmatmul.msk.f32.gmra.mxu2 %vm57_vm0, %v34_v20  ;;  %408 = vmatmul.msk.f32.gmra.mxu3 %vm57_vm0, %v42_v21 }
  0x2e   :  { %385 = vmatmul.msk.f32.gmra.mxu0 %vm57_vm0, %v19_v22  ;;  %393 = vmatmul.msk.f32.gmra.mxu1 %vm57_vm0, %v27_v23 }
  0x2f   :  { %401 = vmatmul.msk.f32.gmra.mxu2 %vm57_vm0, %v35_v24  ;;  %409 = vmatmul.msk.f32.gmra.mxu3 %vm57_vm0, %v43_v25 }
  0x36   :  { %386 = vmatmul.msk.f32.gmra.mxu0 %vm57_vm0, %v20_v26  ;;  %394 = vmatmul.msk.f32.gmra.mxu1 %vm57_vm0, %v28_v27 }
  0x37   :  { %402 = vmatmul.msk.f32.gmra.mxu2 %vm57_vm0, %v36_v28  ;;  %410 = vmatmul.msk.f32.gmra.mxu3 %vm57_vm0, %v44_v29 }
  0x3e   :  { %387 = vmatmul.msk.f32.gmra.mxu0 %vm57_vm0, %v21_v30  ;;  %395 = vmatmul.msk.f32.gmra.mxu1 %vm57_vm0, %v29_v31 }
  0x3f   :  { %403 = vmatmul.msk.f32.gmra.mxu2 %vm57_vm0, %v37_v32  ;;  %411 = vmatmul.msk.f32.gmra.mxu3 %vm57_vm0, %v45_v33 }
  0x46   :  { %388 = vmatmul.msk.f32.gmra.mxu0 %vm57_vm0, %v22_v34  ;;  %396 = vmatmul.msk.f32.gmra.mxu1 %vm57_vm0, %v30_v35 }
  0x47   :  { %404 = vmatmul.msk.f32.gmra.mxu2 %vm57_vm0, %v38_v36  ;;  %412 = vmatmul.msk.f32.gmra.mxu3 %vm57_vm0, %v46_v37 }
  0x8b   :  { %v171_v38 = vpop.f32.mrf.mxu0  ;;  %v195_v39 = vpop.f32.mrf.mxu1 }
  0x8c   :  { %v172_v41 = vadd.f32 %v728_v40, %v171_v38  ;;  %v196_v42 = vadd.f32 %v728_v40, %v195_v39 }
  0x8e   :  { %v267_v49 = vmax.f32 %v172_v41, 0.0  ;;  %v275_v50 = vmax.f32 %v196_v42, 0.0 }
  0x92   :  { %v219_v43 = vpop.f32.mrf.mxu2  ;;  %v243_v44 = vpop.f32.mrf.mxu3 }
  0x93   :  { %v174_v45 = vpop.f32.mrf.mxu0  ;;  %v198_v46 = vpop.f32.mrf.mxu1  ;;  %v220_v55 = vadd.f32 %v728_v40, %v219_v43  ;;  %v244_v56 = vadd.f32 %v728_v40, %v243_v44 }
  0x94   :  { %v175_v47 = vadd.f32 %v728_v40, %v174_v45  ;;  %v199_v48 = vadd.f32 %v728_v40, %v198_v46 }
  0x95   :  { %v283_v63 = vmax.f32 %v220_v55, 0.0  ;;  %v291_v0 = vmax.f32 %v244_v56, 0.0 }
  0x96   :  { %v268_v51 = vmax.f32 %v175_v47, 0.0  ;;  %v276_v52 = vmax.f32 %v199_v48, 0.0 }
  0x98   :  { %v416_v53 = vpack.c.bf16 %v268_v51, %v267_v49  ;;  %v436_v54 = vpack.c.bf16 %v276_v52, %v275_v50 }
  0x9a   :  { %417 = vst [vmem:[#allocation2] sm:$0xff] %v416_v53   ;;  %v222_v57 = vpop.f32.mrf.mxu2  ;;  %v246_v58 = vpop.f32.mrf.mxu3 }
  0x9b   :  { %496 = vst [vmem:[#allocation2 + $0x20] sm:$0xff] %v436_v54   ;;  %v223_v59 = vadd.f32 %v728_v40, %v222_v57  ;;  %v247_v60 = vadd.f32 %v728_v40, %v246_v58  ;;  %v177_v61 = vpop.f32.mrf.mxu0  ;;  %v201_v62 = vpop.f32.mrf.mxu1 }
  0x9c   :  { %v178_v5 = vadd.f32 %v728_v40, %v177_v61  ;;  %v202_v6 = vadd.f32 %v728_v40, %v201_v62 }
  0x9d   :  { %v284_v1 = vmax.f32 %v223_v59, 0.0  ;;  %v292_v2 = vmax.f32 %v247_v60, 0.0 }
  0x9e   :  { %v269_v13 = vmax.f32 %v178_v5, 0.0  ;;  %v277_v14 = vmax.f32 %v202_v6, 0.0 }
  0x9f   :  { %v456_v3 = vpack.c.bf16 %v284_v1, %v283_v63  ;;  %v476_v4 = vpack.c.bf16 %v292_v2, %v291_v0 }
  0xa1   :  { %500 = vst [vmem:[#allocation2 + $0x40] sm:$0xff] %v456_v3  }
  0xa2   :  { %504 = vst [vmem:[#allocation2 + $0x60] sm:$0xff] %v476_v4   ;;  %v225_v7 = vpop.f32.mrf.mxu2  ;;  %v249_v8 = vpop.f32.mrf.mxu3 }
  0xa3   :  { %v180_v9 = vpop.f32.mrf.mxu0  ;;  %v204_v10 = vpop.f32.mrf.mxu1  ;;  %v226_v19 = vadd.f32 %v728_v40, %v225_v7  ;;  %v250_v20 = vadd.f32 %v728_v40, %v249_v8 }
  0xa4   :  { %v181_v11 = vadd.f32 %v728_v40, %v180_v9  ;;  %v205_v12 = vadd.f32 %v728_v40, %v204_v10 }
  0xa5   :  { %v285_v27 = vmax.f32 %v226_v19, 0.0  ;;  %v293_v28 = vmax.f32 %v250_v20, 0.0 }
  0xa6   :  { %v270_v15 = vmax.f32 %v181_v11, 0.0  ;;  %v278_v16 = vmax.f32 %v205_v12, 0.0 }
  0xa8   :  { %v421_v17 = vpack.c.bf16 %v270_v15, %v269_v13  ;;  %v441_v18 = vpack.c.bf16 %v278_v16, %v277_v14 }
  0xaa   :  { %493 = vst [vmem:[#allocation2 + $0x8] sm:$0xff] %v421_v17   ;;  %v228_v21 = vpop.f32.mrf.mxu2  ;;  %v252_v22 = vpop.f32.mrf.mxu3 }
  0xab   :  { %497 = vst [vmem:[#allocation2 + $0x28] sm:$0xff] %v441_v18   ;;  %v229_v23 = vadd.f32 %v728_v40, %v228_v21  ;;  %v253_v24 = vadd.f32 %v728_v40, %v252_v22  ;;  %v183_v25 = vpop.f32.mrf.mxu0  ;;  %v207_v26 = vpop.f32.mrf.mxu1 }
  0xac   :  { %v184_v33 = vadd.f32 %v728_v40, %v183_v25  ;;  %v208_v34 = vadd.f32 %v728_v40, %v207_v26 }
  0xad   :  { %v286_v29 = vmax.f32 %v229_v23, 0.0  ;;  %v294_v30 = vmax.f32 %v253_v24, 0.0 }
  0xae   :  { %v271_v42 = vmax.f32 %v184_v33, 0.0  ;;  %v279_v43 = vmax.f32 %v208_v34, 0.0 }
  0xaf   :  { %v461_v31 = vpack.c.bf16 %v286_v29, %v285_v27  ;;  %v481_v32 = vpack.c.bf16 %v294_v30, %v293_v28 }
  0xb1   :  { %501 = vst [vmem:[#allocation2 + $0x48] sm:$0xff] %v461_v31  }
  0xb2   :  { %505 = vst [vmem:[#allocation2 + $0x68] sm:$0xff] %v481_v32   ;;  %v231_v35 = vpop.f32.mrf.mxu2  ;;  %v255_v36 = vpop.f32.mrf.mxu3 }
  0xb3   :  { %v186_v37 = vpop.f32.mrf.mxu0  ;;  %v210_v38 = vpop.f32.mrf.mxu1  ;;  %v232_v48 = vadd.f32 %v728_v40, %v231_v35  ;;  %v256_v49 = vadd.f32 %v728_v40, %v255_v36 }
  0xb4   :  { %v187_v39 = vadd.f32 %v728_v40, %v186_v37  ;;  %v211_v41 = vadd.f32 %v728_v40, %v210_v38 }
  0xb5   :  { %v287_v56 = vmax.f32 %v232_v48, 0.0  ;;  %v295_v57 = vmax.f32 %v256_v49, 0.0 }
  0xb6   :  { %v272_v44 = vmax.f32 %v187_v39, 0.0  ;;  %v280_v45 = vmax.f32 %v211_v41, 0.0 }
  0xb8   :  { %v426_v46 = vpack.c.bf16 %v272_v44, %v271_v42  ;;  %v446_v47 = vpack.c.bf16 %v280_v45, %v279_v43 }
  0xba   :  { %494 = vst [vmem:[#allocation2 + $0x10] sm:$0xff] %v426_v46   ;;  %v234_v50 = vpop.f32.mrf.mxu2  ;;  %v258_v51 = vpop.f32.mrf.mxu3 }
  0xbb   :  { %498 = vst [vmem:[#allocation2 + $0x30] sm:$0xff] %v446_v47   ;;  %v235_v52 = vadd.f32 %v728_v40, %v234_v50  ;;  %v259_v53 = vadd.f32 %v728_v40, %v258_v51  ;;  %v189_v54 = vpop.f32.mrf.mxu0  ;;  %v213_v55 = vpop.f32.mrf.mxu1 }
  0xbc   :  { %v190_v62 = vadd.f32 %v728_v40, %v189_v54  ;;  %v214_v63 = vadd.f32 %v728_v40, %v213_v55 }
  0xbd   :  { %v288_v58 = vmax.f32 %v235_v52, 0.0  ;;  %v296_v59 = vmax.f32 %v259_v53, 0.0 }
  0xbe   :  { %v273_v6 = vmax.f32 %v190_v62, 0.0  ;;  %v281_v7 = vmax.f32 %v214_v63, 0.0 }
  0xbf   :  { %v466_v60 = vpack.c.bf16 %v288_v58, %v287_v56  ;;  %v486_v61 = vpack.c.bf16 %v296_v59, %v295_v57 }
  0xc1   :  { %502 = vst [vmem:[#allocation2 + $0x50] sm:$0xff] %v466_v60  }
  0xc2   :  { %506 = vst [vmem:[#allocation2 + $0x70] sm:$0xff] %v486_v61   ;;  %v237_v0 = vpop.f32.mrf.mxu2  ;;  %v261_v1 = vpop.f32.mrf.mxu3 }
  0xc3   :  { %v192_v2 = vpop.f32.mrf.mxu0  ;;  %v216_v3 = vpop.f32.mrf.mxu1  ;;  %v238_v12 = vadd.f32 %v728_v40, %v237_v0  ;;  %v262_v13 = vadd.f32 %v728_v40, %v261_v1 }
  0xc4   :  { %v193_v4 = vadd.f32 %v728_v40, %v192_v2  ;;  %v217_v5 = vadd.f32 %v728_v40, %v216_v3 }
  0xc5   :  { %v289_v18 = vmax.f32 %v238_v12, 0.0  ;;  %v297_v19 = vmax.f32 %v262_v13, 0.0 }
  0xc6   :  { %v274_v8 = vmax.f32 %v193_v4, 0.0  ;;  %v282_v9 = vmax.f32 %v217_v5, 0.0 }
  0xc8   :  { %v431_v10 = vpack.c.bf16 %v274_v8, %v273_v6  ;;  %v451_v11 = vpack.c.bf16 %v282_v9, %v281_v7 }
  0xca   :  { %495 = vst [vmem:[#allocation2 + $0x18] sm:$0xff] %v431_v10   ;;  %v240_v14 = vpop.f32.mrf.mxu2  ;;  %v264_v15 = vpop.f32.mrf.mxu3 }
  0xcb   :  { %499 = vst [vmem:[#allocation2 + $0x38] sm:$0xff] %v451_v11   ;;  %v241_v16 = vadd.f32 %v728_v40, %v240_v14  ;;  %v265_v17 = vadd.f32 %v728_v40, %v264_v15 }
  0xcd   :  { %v290_v20 = vmax.f32 %v241_v16, 0.0  ;;  %v298_v21 = vmax.f32 %v265_v17, 0.0 }
  0xcf   :  { %v471_v22 = vpack.c.bf16 %v290_v20, %v289_v18  ;;  %v491_v23 = vpack.c.bf16 %v298_v21, %v297_v19 }
  0xd1   :  { %503 = vst [vmem:[#allocation2 + $0x58] sm:$0xff] %v471_v22  }
  0xd2   :  { %507 = vst [vmem:[#allocation2 + $0x78] sm:$0xff] %v491_v23  }
  0xd3   :  { %375 = dma.vmem_to_hbm [thread:$0]  %s368_s2, 2048, %s370_s8, [#allocation3], %s557_s9, %s557_s9, %s558_s10  }
  0xd4   :  { %554 = dma.done.wait [#allocation3], 2048  }
  0xd5   :  { %555 = vsyncadd [#allocation3], 4294965248 }
  0xd6   :  { %380 = vsyncpa [#allocation3], 1 }

</bundles_post_ra>
